<compile_context>
chip_gen: v5e
topology: v5e:2x2
jax: 0.10.0
libtpu: 0.0.40
codegen_flags: <defaults>
</compile_context>

<pallas_src>
import functools

import numpy as np
import jax
import jax.numpy as jnp
from jax.experimental import pallas as pl
from jax.experimental.pallas import tpu as pltpu


# ----------------------------------------------------------------------------
# init-time glue: STFT bases (mirrors tacotron/waveglow STFT.__init__)
# ----------------------------------------------------------------------------
def make_stft_params(filter_length, hop_length, win_length):
    assert filter_length == win_length
    scale = filter_length / hop_length
    fourier_basis = np.fft.fft(np.eye(filter_length))
    cutoff = filter_length // 2 + 1
    fourier_basis = np.vstack([np.real(fourier_basis[:cutoff, :]),
                               np.imag(fourier_basis[:cutoff, :])])        # (2C, F)
    inverse_basis = np.linalg.pinv(scale * fourier_basis).T                # (2C, F)
    # periodic ('fftbins=True') hann window; pad_center is a no-op (win == F)
    n = np.arange(win_length)
    fft_window = 0.5 - 0.5 * np.cos(2.0 * np.pi * n / win_length)
    forward_basis = fourier_basis * fft_window[None, :]
    inverse_basis = inverse_basis * fft_window[None, :]
    return (forward_basis.astype(np.float32),
            inverse_basis.astype(np.float32),
            fft_window.astype(np.float32),
            cutoff)


def window_sumsquare(fft_window, n_frames, hop_length, n_fft):
    n = n_fft + hop_length * (n_frames - 1)
    x = np.zeros(n, dtype=np.float32)
    win_sq = (fft_window.astype(np.float64) ** 2).astype(np.float32)
    for i in range(n_frames):
        s = i * hop_length
        x[s:min(n, s + n_fft)] += win_sq[:max(0, min(n_fft, n - s))]
    return x


# ----------------------------------------------------------------------------
# Pallas kernel: fused framing -> STFT -> denoise -> iSTFT -> overlap-add
# ----------------------------------------------------------------------------
def _denoiser_kernel(chunks_ref, mask_ref, fwd_ref, inv_ref, bias_ref, iws_ref,
                     out_ref, *, n_overlap, hop, c_pad):
    chunks = chunks_ref[...]                                   # (M, hop)
    m = chunks.shape[0]

    # ---- forward STFT straight from hop-sized chunks: frame row t, lane block
    #      j is chunk t+j, so ft = sum_j shift_up_j(chunks) @ fwd[j*hop:(j+1)*hop].
    #      At production hop (>=128) each partial dot is a full MXU K pass, so
    #      this costs the same passes as one fused K=F dot, and it avoids
    #      materializing / DMA-ing the 4x-duplicated frames.
    zrows = jnp.zeros((n_overlap - 1, hop), jnp.float32)
    chunks_ext = jnp.concatenate([chunks, zrows], axis=0)      # (M + n_ov - 1, hop)
    fwd = fwd_ref[...]                                         # (F, 2*Cp)
    ft = jnp.dot(chunks, fwd[0:hop, :], preferred_element_type=jnp.float32)
    for j in range(1, n_overlap):
        ft = ft + jnp.dot(chunks_ext[j:j + m, :],
                          fwd[j * hop:(j + 1) * hop, :],
                          preferred_element_type=jnp.float32)  # (M, 2*Cp)

    # ---- magnitude / denoise gain, computed lane-aligned on the full
    #      (real|imag) width: |X|^2 duplicated into both halves with ONE XLU
    #      lane roll (no slice at an unaligned lane, no lane concat for rec).
    sq = ft * ft
    sq2 = sq + pltpu.roll(sq, shift=c_pad, axis=1)             # (M, 2*Cp)
    r = jax.lax.rsqrt(jnp.where(sq2 > 0.0, sq2, 1.0))          # EUP; mag = sq2*r
    g = jnp.maximum(sq2 * r - bias_ref[...], 0.0) * r          # bias pre-scaled
    g = g * mask_ref[...]                                      # zero synthetic rows
    rec = ft * g                                               # (M, 2*Cp)

    # ---- inverse STFT: ONE matmul against the stacked (2*Cp, F) inverse basis
    contrib = jnp.dot(rec, inv_ref[...],
                      preferred_element_type=jnp.float32)      # (M, F)

    # ---- whole-block overlap-add: output chunk c += contrib[c - j, lane blk j].
    #      One zero-row concat + n_overlap shifted slices over the full block;
    #      rows that would bleed across a batch slab are provably zero because
    #      T_pad >= T + n_overlap - 1 and synthetic rows were masked above.
    f_len = contrib.shape[1]
    cat = jnp.concatenate(
        [jnp.zeros((n_overlap - 1, f_len), jnp.float32), contrib], axis=0)
    acc = contrib[:, 0:hop]
    for j in range(1, n_overlap):
        acc = acc + cat[n_overlap - 1 - j:n_overlap - 1 - j + m,
                        j * hop:(j + 1) * hop]

    # one lane-contiguous store of the whole block; at production hop=256 this
    # is an unmasked (lane-dense) store.
    # TODO(synk): for hop < 128 a (bt, n_chunks*hop) layout would need an
    # in-kernel sublane->lane relayout; not done at demo scale.
    out_ref[...] = acc * iws_ref[...]


# ----------------------------------------------------------------------------
# Denoiser wrapper
# ----------------------------------------------------------------------------
class Denoiser:
    def __init__(self, filter_length=64, n_overlap=4, win_length=64, mode='zeros'):
        assert filter_length % n_overlap == 0
        self.F = filter_length
        self.n_overlap = n_overlap
        self.hop = filter_length // n_overlap
        fwd, inv, win, C = make_stft_params(self.F, self.hop, win_length)
        self.C = C
        self.fwd = fwd                       # (2C, F) numpy, reference path
        self.inv = inv                       # (2C, F)
        self.win = win

        # pad each spectral half to a 64-aligned width: lane-aligned halves,
        # fused forward basis N = 2*Cp = 128 (single MXU N pass on v5e) and
        # stacked inverse K = 128 exactly.
        Cp = ((C + 63) // 64) * 64
        self.Cp = Cp
        fwd_fused = np.zeros((self.F, 2 * Cp), np.float32)     # (F, 2Cp)
        fwd_fused[:, :C] = fwd[:C, :].T
        fwd_fused[:, Cp:Cp + C] = fwd[C:, :].T
        inv_fused = np.zeros((2 * Cp, self.F), np.float32)     # (2Cp, F)
        inv_fused[:C, :] = inv[:C, :]
        inv_fused[Cp:Cp + C, :] = inv[C:, :]
        # TODO(synk): at production sizes store these in bf16 for the MXU.
        self.fwd_fused = jnp.asarray(fwd_fused)
        self.inv_fused = jnp.asarray(inv_fused)

        # TODO(synk): real Denoiser builds bias_audio = waveglow.infer(mel, sigma=0.0)
        # from a checkpoint; here we synthesize a deterministic stand-in bias audio
        # and run the same STFT-magnitude math on it.
        if mode == 'zeros':
            seed = 100
        elif mode == 'normal':
            seed = 101
        else:
            raise Exception('Mode {} if not supported'.format(mode))
        bias_audio = 0.05 * jax.random.normal(
            jax.random.PRNGKey(seed), (1, 8 * self.F), jnp.float32)
        bias_mag = self._stft_magnitude(bias_audio)       # (1, T_bias, C)
        self.bias_spec = bias_mag[:, 0, :]                # (1, C), broadcast over time

    # pure-JAX helper used only at init (and by the reference)
    def _stft_magnitude(self, audio):
        F, hop, C = self.F, self.hop, self.C
        padded = jnp.pad(audio, ((0, 0), (F // 2, F // 2)), mode='reflect')
        T = (padded.shape[1] - F) // hop + 1
        idx = np.arange(T)[:, None] * hop + np.arange(F)[None, :]
        frames = padded[:, idx]                                        # (B, T, F)
        ft = jnp.einsum('btf,cf->btc', frames, jnp.asarray(self.fwd))
        real, imag = ft[..., :C], ft[..., C:]
        return jnp.sqrt(real * real + imag * imag)

    def __call__(self, audio, strength=0.1):
        audio = audio.astype(jnp.float32)
        B, num_samples = audio.shape
        F, hop, C, Cp, n_ov = self.F, self.hop, self.C, self.Cp, self.n_overlap

        padded = jnp.pad(audio, ((0, 0), (F // 2, F // 2)), mode='reflect')
        T = (padded.shape[1] - F) // hop + 1
        L = F + hop * (T - 1)
        n_chunks = T + n_ov - 1                            # == L // hop
        # T_pad >= T + n_overlap - 1 guarantees whole-block OLA never bleeds
        # non-zero rows across batch slabs.
        T_pad = ((n_chunks + 7) // 8) * 8

        # rows per grid step: target ~1K rows (MXU M fill), cap by a VMEM budget
        # for the audio block, and keep >=2 parallel grid blocks for v7x's 2 TCs.
        rows_target = 1024
        bt = max(1, min(B, max(1, rows_target // T_pad)))
        bt = max(1, min(bt, (4 << 20) // (T_pad * max(F, hop) * 4)))
        if B >= 2:
            bt = min(bt, (B + 1) // 2)
        B_pad = ((B + bt - 1) // bt) * bt
        m_rows = bt * T_pad

        # hop-sized chunk rows of the padded audio (1x HBM traffic; no 4x frame
        # duplication and no separate XLA gather kernel).
        chunks = padded[:, :L].reshape(B, n_chunks, hop)
        chunks = jnp.pad(chunks, ((0, B_pad - B), (0, T_pad - n_chunks), (0, 0)))
        chunks_flat = chunks.reshape(B_pad * T_pad, hop)

        # per-slab valid-frame mask: frame rows t >= T are synthesized from tail /
        # next-slab chunks and must not contribute to the OLA.
        mask_np = np.zeros((m_rows, 1), np.float32)
        for b in range(bt):
            mask_np[b * T_pad: b * T_pad + T] = 1.0
        row_mask = jnp.asarray(mask_np)

        # bias spectrum: strength folded in, duplicated over the real|imag halves.
        bias_half = jnp.pad(self.bias_spec * float(strength),
                            ((0, 0), (0, Cp - C)))                   # (1, Cp)
        bias2 = jnp.concatenate([bias_half, bias_half], axis=1)      # (1, 2Cp)

        # inverse window-sum normalization with the hop scale (F/hop) folded in,
        # tiled once per local-batch slab on the host.
        wsum = window_sumsquare(self.win, T, hop, F)                 # (L,)
        tiny = np.finfo(np.float32).tiny
        inv_wsum = np.where(wsum > tiny, 1.0 / wsum, 1.0).astype(np.float32)
        iws_np = np.zeros((T_pad, hop), np.float32)
        iws_np[:n_chunks] = (inv_wsum * (float(F) / float(hop))).reshape(n_chunks, hop)
        iws_block = jnp.asarray(np.tile(iws_np, (bt, 1)))            # (m_rows, hop)

        kernel = functools.partial(
            _denoiser_kernel, n_overlap=n_ov, hop=hop, c_pad=Cp)

        # invariant constants: single-buffered (their block index never changes,
        # double-buffering them only wastes VMEM at production F=1024).
        def _const_spec(shape):
            return pl.BlockSpec(shape, lambda *_: (0,) * len(shape),
                                pipeline_mode=pl.Buffered(buffer_count=1))

        out_flat = pl.pallas_call(
            kernel,
            out_shape=jax.ShapeDtypeStruct((B_pad * T_pad, hop), jnp.float32),
            grid_spec=pltpu.PrefetchScalarGridSpec(
                num_scalar_prefetch=0,
                grid=(B_pad // bt,),
                in_specs=[
                    pl.BlockSpec((m_rows, hop), lambda b: (b, 0)),   # audio chunks
                    _const_spec((m_rows, 1)),                        # valid-frame mask
                    _const_spec((F, 2 * Cp)),                        # fused fwd basis
                    _const_spec((2 * Cp, F)),                        # stacked inv basis
                    _const_spec((1, 2 * Cp)),                        # bias*strength (dup)
                    _const_spec((m_rows, hop)),                      # scaled 1/wsum
                ],
                out_specs=pl.BlockSpec((m_rows, hop), lambda b: (b, 0)),
            ),
            compiler_params=pltpu.CompilerParams(
                dimension_semantics=("parallel",),
                vmem_limit_bytes=64 * 1024 * 1024),
        )(chunks_flat, row_mask, self.fwd_fused, self.inv_fused, bias2, iws_block)

        out = out_flat.reshape(B_pad, T_pad, hop)[:B, :n_chunks, :].reshape(B, L)
        out = out[:, F // 2: L - F // 2]                              # trim F/2 each side
        return out[:, None, :]                                        # (B, 1, num_samples)

    # pure-JAX reference (exact semantics of the PyTorch forward) for validation
    def reference(self, audio, strength=0.1):
        audio = audio.astype(jnp.float32)
        B, num_samples = audio.shape
        F, hop, C = self.F, self.hop, self.C
        padded = jnp.pad(audio, ((0, 0), (F // 2, F // 2)), mode='reflect')
        T = (padded.shape[1] - F) // hop + 1
        idx = np.arange(T)[:, None] * hop + np.arange(F)[None, :]
        frames = padded[:, idx]
        fwd = jnp.asarray(self.fwd)
        ft = jnp.einsum('btf,cf->btc', frames, fwd)
        real, imag = ft[..., :C], ft[..., C:]
        mag = jnp.sqrt(real * real + imag * imag)
        phase = jnp.arctan2(imag, real)
        mag_d = jnp.maximum(mag - self.bias_spec[None] * strength, 0.0)
        rec = jnp.concatenate([mag_d * jnp.cos(phase), mag_d * jnp.sin(phase)], axis=-1)
        contrib = jnp.einsum('btc,cf->btf', rec, jnp.asarray(self.inv))
        L = F + hop * (T - 1)
        out = jnp.zeros((B, L), jnp.float32)
        for t in range(T):
            out = out.at[:, t * hop:t * hop + F].add(contrib[:, t, :])
        wsum = window_sumsquare(self.win, T, hop, F)
        tiny = np.finfo(np.float32).tiny
        inv_wsum = np.where(wsum > tiny, 1.0 / wsum, 1.0).astype(np.float32)
        out = out * inv_wsum[None, :] * (float(F) / hop)
        out = out[:, F // 2: L - F // 2]
        return out[:, None, :]


if __name__ == "__main__":
    key = jax.random.PRNGKey(0)
    B, num_samples = 2, 256
    audio = jax.random.normal(key, (B, num_samples), dtype=jnp.float32)

    den = Denoiser(filter_length=64, n_overlap=4, win_length=64, mode='normal')

    out = den(audio, strength=0.1)
    out = jax.block_until_ready(out)
    assert out.shape == (B, 1, num_samples), out.shape

    ref = jax.block_until_ready(den.reference(audio, strength=0.1))
    if not np.allclose(np.asarray(out), np.asarray(ref), rtol=5e-3, atol=5e-3):
        raise AssertionError(
            "Pallas output mismatch, max abs diff = %g"
            % float(np.max(np.abs(np.asarray(out) - np.asarray(ref)))))
    print("KERNEL_OK")
</pallas_src>

<mosaic_0001>
module attributes {stable_mosaic.version = 11 : i64} {
  func.func @_denoiser_kernel(%arg0: i32, %arg1: memref<24x16xf32, #tpu.memory_space<vmem>>, %arg2: memref<24x1xf32, #tpu.memory_space<vmem>>, %arg3: memref<64x128xf32, #tpu.memory_space<vmem>>, %arg4: memref<128x64xf32, #tpu.memory_space<vmem>>, %arg5: memref<1x128xf32, #tpu.memory_space<vmem>>, %arg6: memref<24x16xf32, #tpu.memory_space<vmem>>, %arg7: memref<24x16xf32, #tpu.memory_space<vmem>>) attributes {dimension_semantics = [#tpu.dimension_semantics<parallel>], iteration_bounds = array<i64: 2>, scalar_prefetch = 0 : i64, scratch_operands = 0 : i64, tpu.core_type = #tpu.core_type<tc>, window_params = [{transform_indices = @transform_0, window_bounds = array<i64: 24, 16>}, {pipeline_mode = #tpu.pipeline_mode<synchronous>, transform_indices = @transform_1, window_bounds = array<i64: 24, 1>}, {pipeline_mode = #tpu.pipeline_mode<synchronous>, transform_indices = @transform_2, window_bounds = array<i64: 64, 128>}, {pipeline_mode = #tpu.pipeline_mode<synchronous>, transform_indices = @transform_3, window_bounds = array<i64: 128, 64>}, {pipeline_mode = #tpu.pipeline_mode<synchronous>, transform_indices = @transform_4, window_bounds = array<i64: 1, 128>}, {pipeline_mode = #tpu.pipeline_mode<synchronous>, transform_indices = @transform_5, window_bounds = array<i64: 24, 16>}, {transform_indices = @transform_6, window_bounds = array<i64: 24, 16>}]} {
    %c0 = arith.constant 0 : index
    %c0_0 = arith.constant 0 : index
    %0 = vector.load %arg1[%c0, %c0_0] : memref<24x16xf32, #tpu.memory_space<vmem>>, vector<24x16xf32>
    %cst = arith.constant 0.000000e+00 : f32
    %1 = vector.broadcast %cst : f32 to vector<3x16xf32>
    %2 = tpu.concatenate %0, %1 in 0 : vector<24x16xf32>, vector<3x16xf32> -> vector<27x16xf32>
    %c0_1 = arith.constant 0 : index
    %c0_2 = arith.constant 0 : index
    %3 = vector.load %arg3[%c0_1, %c0_2] : memref<64x128xf32, #tpu.memory_space<vmem>>, vector<64x128xf32>
    %4 = vector.extract_strided_slice %3 {offsets = [0, 0], sizes = [16, 128], strides = [1, 1]} : vector<64x128xf32> to vector<16x128xf32>
    %cst_3 = arith.constant dense<0.000000e+00> : vector<24x128xf32>
    %5 = tpu.matmul %0, %4, %cst_3 {dimension_numbers = #tpu.dot_dimension_numbers<[1], [0], [0], [1], [0, 0, 1, 1], [], []>} : vector<24x16xf32>, vector<16x128xf32>, vector<24x128xf32> -> vector<24x128xf32>
    %6 = vector.extract_strided_slice %2 {offsets = [1, 0], sizes = [24, 16], strides = [1, 1]} : vector<27x16xf32> to vector<24x16xf32>
    %7 = vector.extract_strided_slice %3 {offsets = [16, 0], sizes = [16, 128], strides = [1, 1]} : vector<64x128xf32> to vector<16x128xf32>
    %cst_4 = arith.constant dense<0.000000e+00> : vector<24x128xf32>
    %8 = tpu.matmul %6, %7, %cst_4 {dimension_numbers = #tpu.dot_dimension_numbers<[1], [0], [0], [1], [0, 0, 1, 1], [], []>} : vector<24x16xf32>, vector<16x128xf32>, vector<24x128xf32> -> vector<24x128xf32>
    %9 = arith.addf %5, %8 : vector<24x128xf32>
    %10 = vector.extract_strided_slice %2 {offsets = [2, 0], sizes = [24, 16], strides = [1, 1]} : vector<27x16xf32> to vector<24x16xf32>
    %11 = vector.extract_strided_slice %3 {offsets = [32, 0], sizes = [16, 128], strides = [1, 1]} : vector<64x128xf32> to vector<16x128xf32>
    %cst_5 = arith.constant dense<0.000000e+00> : vector<24x128xf32>
    %12 = tpu.matmul %10, %11, %cst_5 {dimension_numbers = #tpu.dot_dimension_numbers<[1], [0], [0], [1], [0, 0, 1, 1], [], []>} : vector<24x16xf32>, vector<16x128xf32>, vector<24x128xf32> -> vector<24x128xf32>
    %13 = arith.addf %9, %12 : vector<24x128xf32>
    %14 = vector.extract_strided_slice %2 {offsets = [3, 0], sizes = [24, 16], strides = [1, 1]} : vector<27x16xf32> to vector<24x16xf32>
    %15 = vector.extract_strided_slice %3 {offsets = [48, 0], sizes = [16, 128], strides = [1, 1]} : vector<64x128xf32> to vector<16x128xf32>
    %cst_6 = arith.constant dense<0.000000e+00> : vector<24x128xf32>
    %16 = tpu.matmul %14, %15, %cst_6 {dimension_numbers = #tpu.dot_dimension_numbers<[1], [0], [0], [1], [0, 0, 1, 1], [], []>} : vector<24x16xf32>, vector<16x128xf32>, vector<24x128xf32> -> vector<24x128xf32>
    %17 = arith.addf %13, %16 : vector<24x128xf32>
    %18 = arith.mulf %17, %17 : vector<24x128xf32>
    %c64_i32 = arith.constant 64 : i32
    %19 = tpu.dynamic_rotate %18 by %c64_i32 dim 1 : vector<24x128xf32>, i32 -> vector<24x128xf32>
    %20 = arith.addf %18, %19 : vector<24x128xf32>
    %cst_7 = arith.constant 0.000000e+00 : f32
    %21 = vector.broadcast %cst_7 : f32 to vector<24x128xf32>
    %22 = arith.cmpf ogt, %20, %21 : vector<24x128xf32>
    %cst_8 = arith.constant 1.000000e+00 : f32
    %23 = vector.broadcast %cst_8 : f32 to vector<24x128xf32>
    %24 = arith.select %22, %20, %23 : vector<24x128xi1>, vector<24x128xf32>
    %25 = math.rsqrt %24 : vector<24x128xf32>
    %26 = arith.mulf %20, %25 : vector<24x128xf32>
    %c0_9 = arith.constant 0 : index
    %c0_10 = arith.constant 0 : index
    %27 = vector.load %arg5[%c0_9, %c0_10] : memref<1x128xf32, #tpu.memory_space<vmem>>, vector<1x128xf32>
    %28 = vector.broadcast %27 : vector<1x128xf32> to vector<24x128xf32>
    %29 = arith.subf %26, %28 : vector<24x128xf32>
    %cst_11 = arith.constant 0.000000e+00 : f32
    %30 = vector.broadcast %cst_11 : f32 to vector<24x128xf32>
    %31 = arith.maximumf %29, %30 : vector<24x128xf32>
    %32 = arith.mulf %31, %25 : vector<24x128xf32>
    %c0_12 = arith.constant 0 : index
    %c0_13 = arith.constant 0 : index
    %33 = vector.load %arg2[%c0_12, %c0_13] : memref<24x1xf32, #tpu.memory_space<vmem>>, vector<24x1xf32>
    %34 = vector.broadcast %33 : vector<24x1xf32> to vector<24x128xf32>
    %35 = arith.mulf %32, %34 : vector<24x128xf32>
    %36 = arith.mulf %17, %35 : vector<24x128xf32>
    %c0_14 = arith.constant 0 : index
    %c0_15 = arith.constant 0 : index
    %37 = vector.load %arg4[%c0_14, %c0_15] : memref<128x64xf32, #tpu.memory_space<vmem>>, vector<128x64xf32>
    %cst_16 = arith.constant dense<0.000000e+00> : vector<24x64xf32>
    %38 = tpu.matmul %36, %37, %cst_16 {dimension_numbers = #tpu.dot_dimension_numbers<[1], [0], [0], [1], [0, 0, 1, 1], [], []>} : vector<24x128xf32>, vector<128x64xf32>, vector<24x64xf32> -> vector<24x64xf32>
    %cst_17 = arith.constant 0.000000e+00 : f32
    %39 = vector.broadcast %cst_17 : f32 to vector<3x64xf32>
    %40 = tpu.concatenate %39, %38 in 0 : vector<3x64xf32>, vector<24x64xf32> -> vector<27x64xf32>
    %41 = vector.extract_strided_slice %38 {offsets = [0, 0], sizes = [24, 16], strides = [1, 1]} : vector<24x64xf32> to vector<24x16xf32>
    %42 = vector.extract_strided_slice %40 {offsets = [2, 16], sizes = [24, 16], strides = [1, 1]} : vector<27x64xf32> to vector<24x16xf32>
    %43 = arith.addf %41, %42 : vector<24x16xf32>
    %44 = vector.extract_strided_slice %40 {offsets = [1, 32], sizes = [24, 16], strides = [1, 1]} : vector<27x64xf32> to vector<24x16xf32>
    %45 = arith.addf %43, %44 : vector<24x16xf32>
    %46 = vector.extract_strided_slice %40 {offsets = [0, 48], sizes = [24, 16], strides = [1, 1]} : vector<27x64xf32> to vector<24x16xf32>
    %47 = arith.addf %45, %46 : vector<24x16xf32>
    %c0_18 = arith.constant 0 : index
    %c0_19 = arith.constant 0 : index
    %48 = vector.load %arg6[%c0_18, %c0_19] : memref<24x16xf32, #tpu.memory_space<vmem>>, vector<24x16xf32>
    %49 = arith.mulf %47, %48 : vector<24x16xf32>
    %c0_20 = arith.constant 0 : index
    %c0_21 = arith.constant 0 : index
    %50 = vector.load %arg7[%c0_20, %c0_21] : memref<24x16xf32, #tpu.memory_space<vmem>>, vector<24x16xf32>
    tpu.vector_store %arg7[%c0_20, %c0_21], %49 {strides = array<i32>} : memref<24x16xf32, #tpu.memory_space<vmem>>, vector<24x16xf32>,
    return
  }
  func.func @transform_0(%arg0: i32) -> (i32, i32) {
    %c0_i32 = arith.constant 0 : i32
    %c0_i32_0 = arith.constant 0 : i32
    return %arg0, %c0_i32 : i32, i32
  }
  func.func @transform_1(%arg0: i32) -> (i32, i32) {
    %c0_i32 = arith.constant 0 : i32
    %c0_i32_0 = arith.constant 0 : i32
    %c0_i32_1 = arith.constant 0 : i32
    return %c0_i32, %c0_i32_0 : i32, i32
  }
  func.func @transform_2(%arg0: i32) -> (i32, i32) {
    %c0_i32 = arith.constant 0 : i32
    %c0_i32_0 = arith.constant 0 : i32
    %c0_i32_1 = arith.constant 0 : i32
    return %c0_i32, %c0_i32_0 : i32, i32
  }
  func.func @transform_3(%arg0: i32) -> (i32, i32) {
    %c0_i32 = arith.constant 0 : i32
    %c0_i32_0 = arith.constant 0 : i32
    %c0_i32_1 = arith.constant 0 : i32
    return %c0_i32, %c0_i32_0 : i32, i32
  }
  func.func @transform_4(%arg0: i32) -> (i32, i32) {
    %c0_i32 = arith.constant 0 : i32
    %c0_i32_0 = arith.constant 0 : i32
    %c0_i32_1 = arith.constant 0 : i32
    return %c0_i32, %c0_i32_0 : i32, i32
  }
  func.func @transform_5(%arg0: i32) -> (i32, i32) {
    %c0_i32 = arith.constant 0 : i32
    %c0_i32_0 = arith.constant 0 : i32
    %c0_i32_1 = arith.constant 0 : i32
    return %c0_i32, %c0_i32_0 : i32, i32
  }
  func.func @transform_6(%arg0: i32) -> (i32, i32) {
    %c0_i32 = arith.constant 0 : i32
    %c0_i32_0 = arith.constant 0 : i32
    return %arg0, %c0_i32 : i32, i32
  }
}

</mosaic_0001>

<bundles_post_ra>
// kernel: tpu_custom_call.1
= control target key start
LH: loop header
LB: loop body
LE: loop exit
PB: predicated region body
PF: predicated region fallthrough
CT: control target
= control target key end

     0   :  { %s812_s21 = smov 0   ;;  %s986_s0 = inlined_call_operand.vmem [shape: f32[48,16], index: 0, kind: input, shape index: {}]   ;;  %s987_s1 = inlined_call_operand.vmem [shape: f32[24,1], index: 1, kind: input, shape index: {}]   ;;  %s988_s2 = inlined_call_operand.vmem [shape: f32[64,128], index: 2, kind: input, shape index: {}]   ;;  %s989_s3 = inlined_call_operand.vmem [shape: f32[128,64], index: 3, kind: input, shape index: {}]   ;;  %s990_s4 = inlined_call_operand.vmem [shape: f32[1,128], index: 4, kind: input, shape index: {}]   ;;  %s991_s5 = inlined_call_operand.vmem [shape: f32[24,16], index: 5, kind: input, shape index: {}]   ;;  %s992_s6 = inlined_call_operand.vmem [shape: f32[48,16], index: 6, kind: output, shape index: {}]  }
   0x1 LB: > { %s686_s22 = sadd.s32 4294967295, %s769_s21   ;;  %p690_p0 = scmp.ge.s32.totalorder %s769_s21, 1  ;;  %s769_s21 = sphi %s812_s21, %s16_s21  }
   0x2   : > { %p213_p1 = scmp.lt.s32.totalorder %s769_s21, 3 }
   0x4   : > { %p214_p2 = pnand %p690_p0, %p213_p1 }
   0x5   : > { %s243_s29 = smul.u32 (!%p214_p2), 3, %s686_s22  ;;  %s773_s25 = smov (!%p214_p2), 64  }
   0x6   : > { %217 = sbr.rel (%p214_p2) target bundleno = 598 (0x256), region = 44  ;;  %s775_s20 = smov (!%p214_p2), 96  }
   0x7   : > { %p244_p3 = scmp.lt.s32.totalorder (!%p214_p2), %s243_s29, 5  ;;  %s776_s22 = smov (!%p214_p2), 80  }
   0xb   : > { %v263_v0 = vld [vmem:[%s988_s2 + $0x28] sm:$0xff]  ;;  %v262_v1 = vld [vmem:[%s988_s2 + $0x20] sm:$0xff]  ;;  %v265_v2 = vld [vmem:[%s988_s2 + $0x38] sm:$0xff]  ;;  %s994_s29 = smov (!%p244_p3, %s243_s29), 5  ;;  %vm278_vm0 = vcmask 130048   ;;  %vm343_vm1 = vcmask 1045504  }
   0xc   : > { %371 = vmatpush.msra.mxu2 %v263_v0  ;;  %414 = vmatpush.msra.mxu3 %v265_v2  ;;  %v261_v3 = vld [vmem:[%s988_s2 + $0x18] sm:$0xff]  ;;  %v259_v4 = vld [vmem:[%s988_s2 + $0x8] sm:$0xff]  ;;  %v264_v5 = vld [vmem:[%s988_s2 + $0x30] sm:$0xff]  ;;  %s691_s16 = sshll.u32 %s994_s29, 3  ;;  %vm386_vm2 = vcmask 1044480   ;;  %vm270_vm3 = vcmask 1046528  }
   0xd   : > { %299 = vmatpush.msra.mxu0 %v261_v3  ;;  %331 = vmatpush.msra.mxu1 %v259_v4  ;;  %v260_v6 = vld [vmem:[%s988_s2 + $0x10] sm:$0xff]  ;;  %v258_v7 = vld [vmem:[%s988_s2] sm:$0xff]  ;;  %s247_s19 = scalar_lea.vmem %s986_s0, %s691_s16  ;;  %v771_v26 = vmov 0.0   ;;  %v772_v39 = vmov 0   ;;  %v494_v42 = vld [vmem:[%s987_s1 + $0x8] sm:$0xff]  ;;  %s253_s27 = scalar_lea.vmem %s992_s6, %s691_s16 }
   0xe   : > { %372 = vmatpush.msra.mxu2 %v262_v1  ;;  %415 = vmatpush.msra.mxu3 %v264_v5  ;;  %v255_v8 = vld [vmem:[%s247_s19] sm:$0xff]  ;;  %v256_v9 = vld [vmem:[%s247_s19 + $0x8] sm:$0xff]  ;;  %v257_v16 = vld [vmem:[%s247_s19 + $0x10] sm:$0xff]  ;;  %v349_v27 = vrot.slane %v771_v26, 2  ;;  %v392_v28 = vrot.slane %v771_v26, 3  ;;  %v276_v29 = vrot.slane %v771_v26, 1 }
   0xf   : > { %300 = vmatpush.msra.mxu0 %v260_v6  ;;  %332 = vmatpush.msra.mxu1 %v258_v7  ;;  %v344_v10 = vrot.slane %v255_v8, 2  ;;  %v345_v11 = vrot.slane %v256_v9, 2  ;;  %v387_v12 = vrot.slane %v255_v8, 3  ;;  %v388_v13 = vrot.slane %v256_v9, 3  ;;  %v493_v36 = vld [vmem:[%s987_s1] sm:$0xff]  ;;  %v495_v56 = vld [vmem:[%s987_s1 + $0x10] sm:$0xff] }
  0x10   : > { %696 = vmatmul.msk.f32.vlgmr.msra.gmra.mxu1 %vm278_vm0, %v255_v8  ;;  %v271_v14 = vrot.slane %v255_v8, 1  ;;  %v272_v15 = vrot.slane %v256_v9, 1  ;;  %v347_v20 = vrot.slane %v257_v16, 2  ;;  %v390_v21 = vrot.slane %v257_v16, 3  ;;  %753 = vset.pattern.permute.xlu1 %v772_v39  ;;  %v532_v61 = vld [vmem:[%s989_s3 + $0x78] sm:$0xff]  ;;  %v531_v62 = vld [vmem:[%s989_s3 + $0x70] sm:$0xff] }
  0x11   : > { %v346_v17 = vsel %vm343_vm1, %v344_v10, %v345_v11  ;;  %v389_v18 = vsel %vm386_vm2, %v387_v12, %v388_v13  ;;  %v274_v22 = vrot.slane %v257_v16, 1  ;;  %754 = vset.pattern.permute.xlu2 %v772_v39  ;;  %755 = vset.pattern.permute.xlu0 %v772_v39  ;;  %v530_v63 = vld [vmem:[%s989_s3 + $0x68] sm:$0xff]  ;;  %v529_v0 = vld [vmem:[%s989_s3 + $0x60] sm:$0xff]  ;;  %v528_v1 = vld [vmem:[%s989_s3 + $0x58] sm:$0xff]  ;;  %s774_s19 = smov 112  }
  0x12   : > { %699 = vmatmul.msk.f32.vlgmr.msra.gmra.mxu2 %vm278_vm0, %v346_v17  ;;  %702 = vmatmul.msk.f32.vlgmr.msra.gmra.mxu3 %vm278_vm0, %v389_v18  ;;  %v273_v19 = vsel %vm270_vm3, %v271_v14, %v272_v15  ;;  %v348_v23 = vsel %vm343_vm1, %v345_v11, %v347_v20  ;;  %v391_v24 = vsel %vm386_vm2, %v388_v13, %v390_v21  ;;  %v527_v2 = vld [vmem:[%s989_s3 + $0x50] sm:$0xff]  ;;  %v526_v3 = vld [vmem:[%s989_s3 + $0x48] sm:$0xff]  ;;  %v525_v4 = vld [vmem:[%s989_s3 + $0x40] sm:$0xff] }
  0x13   : > { %693 = vmatmul.msk.f32.vlgmr.msra.gmra.mxu0 %vm278_vm0, %v273_v19  ;;  %v275_v25 = vsel %vm270_vm3, %v272_v15, %v274_v22  ;;  %v350_v30 = vsel %vm343_vm1, %v347_v20, %v349_v27  ;;  %v393_v31 = vsel %vm386_vm2, %v390_v21, %v392_v28  ;;  %v277_v32 = vsel %vm270_vm3, %v274_v22, %v276_v29  ;;  %v524_v5 = vld [vmem:[%s989_s3 + $0x38] sm:$0xff]  ;;  %v523_v6 = vld [vmem:[%s989_s3 + $0x30] sm:$0xff]  ;;  %v522_v7 = vld [vmem:[%s989_s3 + $0x28] sm:$0xff] }
  0x14   : > { %498 = vperm.xlu2 %754, %v493_v36   ;;  %707 = vmatpush.msrb.mxu1 %v532_v61  ;;  %v521_v8 = vld [vmem:[%s989_s3 + $0x20] sm:$0xff]  ;;  %v519_v10 = vld [vmem:[%s989_s3 + $0x10] sm:$0xff]  ;;  %v518_v11 = vld [vmem:[%s989_s3 + $0x8] sm:$0xff]  ;;  %vm562_vm2 = vcmask 1042432  }
  0x15   : > { %708 = vmatpush.msrb.mxu2 %v532_v61  ;;  %533 = vmatpush.msrb.mxu0 %v532_v61  ;;  %v517_v14 = vld [vmem:[%s989_s3] sm:$0xff] }
  0x16   : > { %709 = vmatpush.msrb.mxu1 %v531_v62 }
  0x17   : > { %710 = vmatpush.msrb.mxu2 %v531_v62  ;;  %534 = vmatpush.msrb.mxu0 %v531_v62 }
  0x18   : > { %697 = vmatmul.msk.f32.gmra.mxu1 %vm278_vm0, %v256_v9  ;;  %v520_v9 = vld [vmem:[%s989_s3 + $0x18] sm:$0xff] }
  0x19   : > { %711 = vmatpush.msrb.mxu1 %v530_v63  ;;  %712 = vmatpush.msrb.mxu2 %v530_v63 }
  0x1a   : > { %700 = vmatmul.msk.f32.gmra.mxu2 %vm278_vm0, %v348_v23  ;;  %703 = vmatmul.msk.f32.gmra.mxu3 %vm278_vm0, %v391_v24 }
  0x1b   : > { %694 = vmatmul.msk.f32.gmra.mxu0 %vm278_vm0, %v275_v25  ;;  %713 = vmatpush.msrb.mxu1 %v529_v0 }
  0x1c   : > { %503 = vperm.xlu2 %754, %v494_v42   ;;  %535 = vmatpush.msrb.mxu0 %v530_v63 }
  0x1d   : > { %714 = vmatpush.msrb.mxu2 %v529_v0  ;;  %715 = vmatpush.msrb.mxu1 %v528_v1 }
  0x1e   : > { %536 = vmatpush.msrb.mxu0 %v529_v0 }
  0x1f   : > { %716 = vmatpush.msrb.mxu2 %v528_v1  ;;  %717 = vmatpush.msrb.mxu1 %v527_v2 }
  0x20   : > { %698 = vmatmul.msk.f32.gmra.mxu1 %vm278_vm0, %v257_v16  ;;  %537 = vmatpush.msrb.mxu0 %v528_v1 }
  0x21   : > { %718 = vmatpush.msrb.mxu2 %v527_v2  ;;  %719 = vmatpush.msrb.mxu1 %v526_v3 }
  0x22   : > { %701 = vmatmul.msk.f32.gmra.mxu2 %vm278_vm0, %v350_v30  ;;  %704 = vmatmul.msk.f32.gmra.mxu3 %vm278_vm0, %v393_v31  ;;  %v756_v31 = vld [vmem:[%s990_s4] ss:$0 sm:$0xff] }
  0x23   : > { %695 = vmatmul.msk.f32.gmra.mxu0 %vm278_vm0, %v277_v32  ;;  %720 = vmatpush.msrb.mxu2 %v526_v3 }
  0x24   : > { %538 = vmatpush.msrb.mxu0 %v527_v2  ;;  %721 = vmatpush.msrb.mxu1 %v525_v4 }
  0x25   : > { %722 = vmatpush.msrb.mxu2 %v525_v4 }
  0x26   : > { %539 = vmatpush.msrb.mxu0 %v526_v3  ;;  %723 = vmatpush.msrb.mxu1 %v524_v5 }
  0x27   : > { %724 = vmatpush.msrb.mxu2 %v524_v5 }
  0x28   : > { %540 = vmatpush.msrb.mxu0 %v525_v4  ;;  %725 = vmatpush.msrb.mxu1 %v523_v6 }
  0x29   : > { %726 = vmatpush.msrb.mxu2 %v523_v6 }
  0x2a   : > { %541 = vmatpush.msrb.mxu0 %v524_v5  ;;  %727 = vmatpush.msrb.mxu1 %v522_v7 }
  0x2b   : > { %728 = vmatpush.msrb.mxu2 %v522_v7 }
  0x2c   : > { %542 = vmatpush.msrb.mxu0 %v523_v6  ;;  %729 = vmatpush.msrb.mxu1 %v521_v8 }
  0x2d   : > { %730 = vmatpush.msrb.mxu2 %v521_v8 }
  0x2e   : > { %543 = vmatpush.msrb.mxu0 %v522_v7  ;;  %731 = vmatpush.msrb.mxu1 %v520_v9 }
  0x2f   : > { %732 = vmatpush.msrb.mxu2 %v520_v9 }
  0x30   : > { %544 = vmatpush.msrb.mxu0 %v521_v8  ;;  %733 = vmatpush.msrb.mxu1 %v519_v10 }
  0x31   : > { %734 = vmatpush.msrb.mxu2 %v519_v10 }
  0x32   : > { %545 = vmatpush.msrb.mxu0 %v520_v9  ;;  %735 = vmatpush.msrb.mxu1 %v518_v11 }
  0x33   : > { %736 = vmatpush.msrb.mxu2 %v518_v11 }
  0x34   : > { %546 = vmatpush.msrb.mxu0 %v519_v10  ;;  %737 = vmatpush.msrb.mxu1 %v517_v14 }
  0x35   : > { %738 = vmatpush.msrb.mxu2 %v517_v14 }
  0x36   : > { %547 = vmatpush.msrb.mxu0 %v518_v11 }
  0x38   : > { %548 = vmatpush.msrb.mxu0 %v517_v14 }
  0x6e   : > { %v499_v25 = vpop.permute.xlu2 %498 }
  0x8d   : > { %v334_v33 = vpop.f32.mrf.mxu1 }
  0x90   : > { %v302_v34 = vpop.f32.mrf.mxu0 }
  0x91   : > { %v335_v53 = vadd.f32 %v334_v33, %v302_v34 }
  0x95   : > { %v337_v35 = vpop.f32.mrf.mxu1  ;;  %v374_v37 = vpop.f32.mrf.mxu2 }
  0x96   : > { %v417_v38 = vpop.f32.mrf.mxu3  ;;  %v383_v57 = vadd.f32 %v374_v37, %v335_v53 }
  0x98   : > { %v305_v40 = vpop.f32.mrf.mxu0  ;;  %v896_v59 = vadd.f32 %v417_v38, %v383_v57 }
  0x99   : > { %v338_v41 = vadd.f32 %v337_v35, %v305_v40 }
  0x9a   : > { %v900_v60 = vmul.f32 %v896_v59, %v896_v59 }
  0x9d   : > { %v377_v43 = vpop.f32.mrf.mxu2  ;;  %v340_v46 = vpop.f32.mrf.mxu1 }
  0x9e   : > { %v420_v44 = vpop.f32.mrf.mxu3  ;;  %v384_v45 = vadd.f32 %v377_v43, %v338_v41  ;;  %v504_v41 = vpop.permute.xlu2 %503 }
  0xa0   : > { %v879_v47 = vadd.f32 %v420_v44, %v384_v45  ;;  %v308_v48 = vpop.f32.mrf.mxu0 }
  0xa1   : > { %v341_v49 = vadd.f32 %v340_v46, %v308_v48 }
  0xa2   : > { %v883_v50 = vmul.f32 %v879_v47, %v879_v47 }
  0xa4   : > { %434 = vrot.lane.b32.xlu1 %v883_v50, %s773_s25 }
  0xa5   : > { %v380_v51 = vpop.f32.mrf.mxu2 }
  0xa6   : > { %v423_v52 = vpop.f32.mrf.mxu3  ;;  %v385_v54 = vadd.f32 %v380_v51, %v341_v49 }
  0xa8   : > { %v886_v55 = vadd.f32 %v423_v52, %v385_v54 }
  0xaa   : > { %v893_v58 = vmul.f32 %v886_v55, %v886_v55 }
  0xac   : > { %436 = vrot.lane.b32.xlu0 %v893_v58, %s773_s25  ;;  %508 = vperm.xlu1 %753, %v495_v56  }
  0xb4   : > { %432 = vrot.lane.b32.xlu0 %v900_v60, %s773_s25 }
 0x116   : > { %v435_v12 = vpop.permute.xlu1 %434 }
 0x117   : > { %v439_v13 = vadd.f32 %v435_v12, %v883_v50 }
 0x119   : > { %vm442_vm4 = vcmp.gt.f32.partialorder %v439_v13, 0.0 }
 0x11a   : > { %v445_v15 = vsel %vm442_vm4, %v439_v13, 1.0 }
 0x11b   : > { %757 = vrsqrt.f32 %v445_v15  ;;  %vm463_vm8 = vweird.f32 %v445_v15 }
 0x11e   : > { %v437_v16 = vpop.permute.xlu0 %436  ;;  %v509_v56 = vpop.permute.xlu1 %508 }
 0x11f   : > { %v440_v17 = vadd.f32 %v437_v16, %v893_v58 }
 0x121   : > { %v758_v18 = vpop.eup %757  ;;  %vm443_vm5 = vcmp.gt.f32.partialorder %v440_v17, 0.0 }
 0x122   : > { %v458_v19 = vmul.f32 %v758_v18, %v445_v15  ;;  %v446_v20 = vsel %vm443_vm5, %v440_v17, 1.0  ;;  %vm464_vm6 = vweird.f32 %v758_v18 }
 0x123   : > { %759 = vrsqrt.f32 %v446_v20  ;;  %vm465_vm9 = vmor %vm463_vm8, %vm464_vm6  ;;  %vm473_vm11 = vweird.f32 %v446_v20 }
 0x124   : > { %v459_v21 = vmul.f32 %v758_v18, %v458_v19 }
 0x126   : > { %v460_v22 = vmul.f32 0.5, %v459_v21  ;;  %v433_v23 = vpop.permute.xlu0 %432 }
 0x127   : > { %v438_v24 = vadd.f32 %v433_v23, %v900_v60 }
 0x128   : > { %v461_v26 = vsub.f32 1.5, %v460_v22 }
 0x129   : > { %v760_v27 = vpop.eup %759  ;;  %vm441_vm7 = vcmp.gt.f32.partialorder %v438_v24, 0.0 }
 0x12a   : > { %v468_v28 = vmul.f32 %v760_v27, %v446_v20  ;;  %v444_v29 = vsel %vm441_vm7, %v438_v24, 1.0  ;;  %v462_v30 = vmul.f32 %v758_v18, %v461_v26  ;;  %vm474_vm10 = vweird.f32 %v760_v27 }
 0x12b   : > { %761 = vrsqrt.f32 %v444_v29  ;;  %vm475_vm12 = vmor %vm473_vm11, %vm474_vm10  ;;  %vm453_vm14 = vweird.f32 %v444_v29 }
 0x12c   : > { %v469_v32 = vmul.f32 %v760_v27, %v468_v28  ;;  %v466_v33 = vsel %vm465_vm9, %v758_v18, %v462_v30  ;;  %v623_v28 = vld [vmem:[%s991_s5 + $0x10] sm:$0xff] }
 0x12d   : > { %v478_v34 = vmul.f32 %v466_v33, %v439_v13 }
 0x12e   : > { %v470_v35 = vmul.f32 0.5, %v469_v32 }
 0x12f   : > { %v485_v36 = vsub.f32 %v478_v34, %v756_v31 }
 0x130   : > { %v471_v37 = vsub.f32 1.5, %v470_v35 }
 0x131   : > { %v762_v38 = vpop.eup %761  ;;  %v488_v39 = vmax.f32 %v485_v36, 0.0 }
 0x132   : > { %v448_v40 = vmul.f32 %v762_v38, %v444_v29  ;;  %v472_v42 = vmul.f32 %v760_v27, %v471_v37  ;;  %vm454_vm13 = vweird.f32 %v762_v38 }
 0x133   : > { %v491_v43 = vmul.f32 %v488_v39, %v466_v33  ;;  %vm455_vm15 = vmor %vm453_vm14, %vm454_vm13 }
 0x134   : > { %v449_v44 = vmul.f32 %v762_v38, %v448_v40  ;;  %v476_v45 = vsel %vm475_vm12, %v760_v27, %v472_v42  ;;  %v622_v40 = vld [vmem:[%s991_s5 + $0x8] sm:$0xff]  ;;  %v621_v42 = vld [vmem:[%s991_s5] sm:$0xff] }
 0x135   : > { %v512_v46 = vmul.f32 %v504_v41, %v491_v43  ;;  %v479_v48 = vmul.f32 %v476_v45, %v440_v17 }
 0x136   : > { %v450_v49 = vmul.f32 0.5, %v449_v44 }
 0x137   : > { %v515_v50 = vmul.f32 %v512_v46, %v879_v47  ;;  %v486_v51 = vsub.f32 %v479_v48, %v756_v31 }
 0x138   : > { %v451_v52 = vsub.f32 1.5, %v450_v49 }
 0x139   : > { %552 = vmatmul.f32.vlgmr.msrb.gmra.mxu1 %v515_v50  ;;  %v489_v53 = vmax.f32 %v486_v51, 0.0 }
 0x13a   : > { %v452_v54 = vmul.f32 %v762_v38, %v451_v52 }
 0x13b   : > { %v492_v57 = vmul.f32 %v489_v53, %v476_v45 }
 0x13c   : > { %v456_v58 = vsel %vm455_vm15, %v762_v38, %v452_v54 }
 0x13d   : > { %v477_v60 = vmul.f32 %v456_v58, %v438_v24  ;;  %v513_v61 = vmul.f32 %v509_v56, %v492_v57 }
 0x13f   : > { %v484_v62 = vsub.f32 %v477_v60, %v756_v31  ;;  %v516_v63 = vmul.f32 %v513_v61, %v886_v55 }
 0x141   : > { %v487_v0 = vmax.f32 %v484_v62, 0.0  ;;  %555 = vmatmul.f32.vlgmr.msrb.gmra.mxu2 %v516_v63 }
 0x143   : > { %v490_v1 = vmul.f32 %v487_v0, %v456_v58 }
 0x145   : > { %v511_v47 = vmul.f32 %v499_v25, %v490_v1 }
 0x147   : > { %v514_v2 = vmul.f32 %v511_v47, %v896_v59 }
 0x149   : > { %549 = vmatmul.f32.vlgmr.msrb.gmra.mxu0 %v514_v2 }
 0x1b6   : > { %v553_v3 = vpop.f32.mrf.mxu1 }
 0x1b7   : > { %v564_v5 = vrot.slane %v553_v3, 5 }
 0x1c4   : > { %v556_v4 = vpop.f32.mrf.mxu2 }
 0x1c5   : > { %v566_v6 = vrot.slane %v556_v4, 5 }
 0x1c6   : > { %v550_v7 = vpop.f32.mrf.mxu0 }
 0x1c7   : > { %v576_v8 = vrot.slane %v566_v6, 2  ;;  %v563_v9 = vrot.slane %v550_v7, 5  ;;  %v567_v10 = vsel %vm562_vm2, %v564_v5, %v566_v6  ;;  %v595_v17 = vrot.slane %v566_v6, 1 }
 0x1c8   : > { %v574_v11 = vrot.slane %v567_v10, 2  ;;  %v593_v18 = vrot.slane %v567_v10, 1 }
 0x1c9   : > { %v565_v12 = vsel %vm562_vm2, %v563_v9, %v564_v5  ;;  %v569_v13 = vsel %vm562_vm2, 0.0, %v563_v9 }
 0x1ca   : > { %v571_v55 = vrot.slane %v569_v13, 2  ;;  %v577_v14 = vsel %vm343_vm1, %v574_v11, %v576_v8  ;;  %v572_v15 = vrot.slane %v565_v12, 2  ;;  %v590_v19 = vrot.slane %v569_v13, 1 }
 0x1cb   : > { %582 = vrot.lane.b32.xlu2 %v577_v14, %s774_s19  ;;  %v591_v20 = vrot.slane %v565_v12, 1  ;;  %v596_v21 = vsel %vm270_vm3, %v593_v18, %v595_v17 }
 0x1cc   : > { %v575_v59 = vsel %vm343_vm1, %v572_v15, %v574_v11  ;;  %v573_v16 = vsel %vm343_vm1, %v571_v55, %v572_v15 }
 0x1cd   : > { %580 = vrot.lane.b32.xlu1 %v575_v59, %s774_s19  ;;  %578 = vrot.lane.b32.xlu0 %v573_v16, %s774_s19  ;;  %v594_v22 = vsel %vm270_vm3, %v591_v20, %v593_v18  ;;  %v592_v23 = vsel %vm270_vm3, %v590_v19, %v591_v20 }
 0x1d3   : > { %601 = vrot.lane.b32.xlu2 %v596_v21, %s775_s20 }
 0x1d5   : > { %599 = vrot.lane.b32.xlu1 %v594_v22, %s775_s20  ;;  %597 = vrot.lane.b32.xlu0 %v592_v23, %s775_s20 }
 0x1db   : > { %613 = vrot.lane.b32.xlu2 %v567_v10, %s776_s22 }
 0x1dd   : > { %611 = vrot.lane.b32.xlu1 %v565_v12, %s776_s22  ;;  %609 = vrot.lane.b32.xlu0 %v569_v13, %s776_s22 }
 0x225   : > { %v583_v24 = vpop.permute.xlu2 %582 }
 0x226   : > { %v589_v26 = vadd.f32 %v583_v24, %v556_v4 }
 0x22d   : > { %v602_v25 = vpop.permute.xlu2 %601 }
 0x22e   : > { %v608_v27 = vadd.f32 %v602_v25, %v589_v26 }
 0x235   : > { %v614_v29 = vpop.permute.xlu2 %613 }
 0x236   : > { %v620_v30 = vadd.f32 %v614_v29, %v608_v27 }
 0x238   : > { %v626_v31 = vmul.f32 %v623_v28, %v620_v30 }
 0x23a   : > { %629 = vst.msk [vmem:[%s253_s27 + $0x10] sm:$0xff] %vm278_vm0, %v626_v31 }
 0x23f   : > { %v581_v32 = vpop.permute.xlu1 %580  ;;  %v579_v33 = vpop.permute.xlu0 %578 }
 0x240   : > { %v588_v36 = vadd.f32 %v581_v32, %v553_v3  ;;  %v587_v37 = vadd.f32 %v579_v33, %v550_v7 }
 0x247   : > { %v600_v34 = vpop.permute.xlu1 %599  ;;  %v598_v35 = vpop.permute.xlu0 %597 }
 0x248   : > { %v607_v38 = vadd.f32 %v600_v34, %v588_v36  ;;  %v606_v39 = vadd.f32 %v598_v35, %v587_v37 }
 0x24f   : > { %v612_v41 = vpop.permute.xlu1 %611  ;;  %v610_v43 = vpop.permute.xlu0 %609 }
 0x250   : > { %v619_v44 = vadd.f32 %v612_v41, %v607_v38  ;;  %v618_v45 = vadd.f32 %v610_v43, %v606_v39 }
 0x252   : > { %v625_v46 = vmul.f32 %v622_v40, %v619_v44  ;;  %v624_v48 = vmul.f32 %v621_v42, %v618_v45 }
 0x254   : > { %628 = vst.msk [vmem:[%s253_s27 + $0x8] sm:$0xff] %vm278_vm0, %v625_v46 }
 0x255   : > { %627 = vst.msk [vmem:[%s253_s27] sm:$0xff] %vm278_vm0, %v624_v48 }
 0x256 PF: > { %s16_s21 = sadd.s32 1, %s769_s21  }
 0x257   : > { %p13_p4 = scmp.ge.s32.totalorder %s16_s21, 4  }
 0x259   :  { %15 = sbr.rel (!%p13_p4) target bundleno = 1 (0x1), region = 74 }

</bundles_post_ra>
